<compile_context>
chip_gen: v6e
topology: v6e:2x2x1
jax: 0.10.0
libtpu: 0.0.40
codegen_flags: <defaults>
</compile_context>

<pallas_src>
import functools
import math

import jax
import jax.numpy as jnp
from jax.experimental import pallas as pl
from jax.experimental.pallas import tpu as pltpu


def _pick_tile(n: int, target: int = 256) -> int:
    """Largest multiple-of-8 divisor of n that is <= target (or n itself)."""
    if n <= target:
        return n
    best = 0
    for t in range(8, target + 1, 8):
        if n % t == 0:
            best = t
    return best if best else n


# ---------------------------------------------------------------------------
# Kernel 1: head-major QKV projection.  grid = (B, S/ts, H).
# ---------------------------------------------------------------------------
def _qkv_proj_kernel(x_ref, w_ref, b_ref, o_ref):
    # x_ref: (1, ts, D); w_ref: (3, 1, D, dh); b_ref: (3, 1, 1, dh)
    # o_ref: (3, 1, 1, ts, dh)   (planes: 0=q, 1=k, 2=v)
    x = x_ref[0]
    for p in range(3):                       # static unroll over q/k/v planes
        y = jnp.dot(x, w_ref[p, 0], preferred_element_type=jnp.float32)
        o_ref[p, 0, 0] = (y + b_ref[p, 0]).astype(o_ref.dtype)


# ---------------------------------------------------------------------------
# Kernel 2: flash-style attention + fused per-head output projection.
#   grid = (B, S/tq, H, S/tk); KV axis is an online-softmax reduction, the
#   head axis is a reduction into the (tq, D) out-projection accumulator.
#   The 1/sqrt(dh) scale is already folded into q (via the q-plane weights).
# ---------------------------------------------------------------------------
def _flash_attn_kernel(q_ref, k_ref, v_ref, wo_ref, bo_ref, o_ref,
                       m_ref, l_ref, acc_ref, oacc_ref, *, causal):
    h = pl.program_id(2)
    ki = pl.program_id(3)
    n_h = pl.num_programs(2)
    n_kv = pl.num_programs(3)

    @pl.when(jnp.logical_and(h == 0, ki == 0))
    def _():                                   # new (batch, q-tile)
        oacc_ref[...] = jnp.zeros_like(oacc_ref)

    @pl.when(ki == 0)
    def _():                                   # new (batch, q-tile, head)
        m_ref[...] = jnp.full_like(m_ref, -jnp.inf)
        l_ref[...] = jnp.zeros_like(l_ref)
        acc_ref[...] = jnp.zeros_like(acc_ref)

    q = q_ref[0, 0, 0]                         # (tq, dh)  (already scaled)
    k = k_ref[0, 0, 0]                         # (tk, dh)
    v = v_ref[0, 0, 0]                         # (tk, dh)

    # Scores without transposing K: contract the last dim of both operands.
    s = jax.lax.dot_general(q, k, (((1,), (1,)), ((), ())),
                            preferred_element_type=jnp.float32)

    if causal:  # static flag -> zero cost when False (module default)
        tq, tk = s.shape
        qi = pl.program_id(1)
        row = qi * tq + jax.lax.broadcasted_iota(jnp.int32, (tq, tk), 0)
        col = ki * tk + jax.lax.broadcasted_iota(jnp.int32, (tq, tk), 1)
        s = jnp.where(col > row, -jnp.inf, s)
        # TODO(synk): fully-masked KV tiles (ki*tk > qi*tq+tq-1) could be
        # skipped entirely with a pl.when guard; not needed for the default.

    m_prev = m_ref[...]
    m_new = jnp.maximum(m_prev, jnp.max(s, axis=-1, keepdims=True))
    alpha = jnp.exp(m_prev - m_new)
    p = jnp.exp(s - m_new)
    l_ref[...] = alpha * l_ref[...] + jnp.sum(p, axis=-1, keepdims=True)
    acc_ref[...] = alpha * acc_ref[...] + jnp.dot(
        p.astype(v.dtype), v, preferred_element_type=jnp.float32)
    m_ref[...] = m_new

    @pl.when(ki == n_kv - 1)
    def _():
        # Normalize once per (q-tile, head) and fold this head straight into
        # the output projection (no concatenate over heads).
        # approx=False keeps the f32 self-test tight; flip to approx=True for
        # an EUP-routed reciprocal in production.
        attn_h = acc_ref[...] * pl.reciprocal(l_ref[...], approx=False)
        oacc_ref[...] += jnp.dot(attn_h.astype(wo_ref.dtype), wo_ref[0],
                                 preferred_element_type=jnp.float32)

    @pl.when(jnp.logical_and(h == n_h - 1, ki == n_kv - 1))
    def _():
        o_ref[0] = (oacc_ref[...] + bo_ref[...]).astype(o_ref.dtype)


def self_attention(x, w_in, b_in, w_out, b_out, *, n_heads: int,
                   causal: bool = False):
    """x: (B, S, D). w_in: (D, 3D), b_in: (3D,), w_out: (D, D), b_out: (D,).
    Weights are already in x @ W orientation (transposed vs. PyTorch)."""
    B, S, D = x.shape
    H = n_heads
    assert D % H == 0, "d_emb must be divisible by n_heads"
    dh = D // H

    # Head-major parameter layouts (trace-time reshapes, no in-kernel work).
    # w_in's columns are already head-blocked ([q|k|v] x [h0|h1|...]).
    w_h = w_in.reshape(D, 3, H, dh).transpose(1, 2, 0, 3)     # (3, H, D, dh)
    b_h = b_in.reshape(3, H, 1, dh)                           # (3, H, 1, dh)
    # Fold the 1/sqrt(dh) attention scale into the q-plane weights/bias: this
    # removes a per-step (tq, tk) multiply from the inner KV loop and only
    # touches O(D*dh) weight elements once, outside the hot kernel.
    scale = 1.0 / math.sqrt(dh)
    qkv_scale = jnp.array([scale, 1.0, 1.0], dtype=w_h.dtype)
    w_h = w_h * qkv_scale.reshape(3, 1, 1, 1)
    b_h = b_h * qkv_scale.reshape(3, 1, 1, 1)
    w_out_h = w_out.reshape(H, dh, D)                         # (H, dh, D)
    b_out2 = b_out.reshape(1, D)                              # (1, D)

    ts = _pick_tile(S)      # s-tile for projection
    tq = _pick_tile(S)      # q-tile
    tk = _pick_tile(S)      # kv-tile
    n_s, n_q, n_kv = S // ts, S // tq, S // tk

    # Raise the scoped-VMEM cap only once the per-step working set outgrows
    # the 16/32 MiB defaults (48 MiB stays under v7x's 64 MiB physical VMEM).
    itemsize = x.dtype.itemsize
    step_bytes = (itemsize * 2 * (tq * dh + 2 * tk * dh + dh * D + D + tq * D)
                  + 4 * tq * (2 + dh + D))
    vmem_limit = 48 * 1024 * 1024 if step_bytes > 8 * 1024 * 1024 else None
    # NOTE: at toy shapes (S=8, D=32) the grid steps below cost more than a
    # single whole-array block would (and dh<128 means masked lane stores);
    # the tiling pays off at realistic S, D.

    # ---- kernel 1: head-major QKV projection ----
    qkv_h = pl.pallas_call(
        _qkv_proj_kernel,
        out_shape=jax.ShapeDtypeStruct((3, H, B, S, dh), x.dtype),
        grid_spec=pltpu.PrefetchScalarGridSpec(
            num_scalar_prefetch=0,
            grid=(B, n_s, H),
            in_specs=[
                pl.BlockSpec((1, ts, D), lambda b, si, h: (b, si, 0)),
                pl.BlockSpec((3, 1, D, dh), lambda b, si, h: (0, h, 0, 0)),
                pl.BlockSpec((3, 1, 1, dh), lambda b, si, h: (0, h, 0, 0)),
            ],
            out_specs=pl.BlockSpec((3, 1, 1, ts, dh),
                                   lambda b, si, h: (0, h, b, si, 0)),
        ),
        compiler_params=pltpu.CompilerParams(
            dimension_semantics=("parallel", "parallel", "parallel"),
            vmem_limit_bytes=vmem_limit),
    )(x, w_h, b_h)

    # ---- kernel 2: flash attention + fused out-projection ----
    kernel = functools.partial(_flash_attn_kernel, causal=causal)
    out = pl.pallas_call(
        kernel,
        out_shape=jax.ShapeDtypeStruct((B, S, D), x.dtype),
        grid_spec=pltpu.PrefetchScalarGridSpec(
            num_scalar_prefetch=0,
            grid=(B, n_q, H, n_kv),
            in_specs=[
                # qkv_h is passed three times: plane 0 = q, 1 = k, 2 = v.
                pl.BlockSpec((1, 1, 1, tq, dh),
                             lambda b, qi, h, ki: (0, h, b, qi, 0)),
                pl.BlockSpec((1, 1, 1, tk, dh),
                             lambda b, qi, h, ki: (1, h, b, ki, 0)),
                pl.BlockSpec((1, 1, 1, tk, dh),
                             lambda b, qi, h, ki: (2, h, b, ki, 0)),
                pl.BlockSpec((1, dh, D), lambda b, qi, h, ki: (h, 0, 0)),
                pl.BlockSpec((1, D), lambda b, qi, h, ki: (0, 0)),
            ],
            out_specs=pl.BlockSpec((1, tq, D), lambda b, qi, h, ki: (b, qi, 0)),
            scratch_shapes=[
                pltpu.VMEM((tq, 1), jnp.float32),    # running max  m
                pltpu.VMEM((tq, 1), jnp.float32),    # running sum  l
                pltpu.VMEM((tq, dh), jnp.float32),   # per-head acc
                pltpu.VMEM((tq, D), jnp.float32),    # out-projection acc
            ],
        ),
        compiler_params=pltpu.CompilerParams(
            dimension_semantics=("parallel", "parallel", "arbitrary", "arbitrary"),
            vmem_limit_bytes=vmem_limit),
    )(qkv_h, qkv_h, qkv_h, w_out_h, b_out2)
    return out


def _reference(x, w_in, b_in, w_out, b_out, n_heads, causal=False):
    """Pure-JAX reference mirroring the PyTorch forward."""
    B, S, D = x.shape
    dh = D // n_heads
    qkv = x @ w_in + b_in                              # (B, S, 3D)
    q, k, v = jnp.split(qkv, 3, axis=-1)

    def heads(t):                                      # (B, H, S, dh)
        return t.reshape(B, S, n_heads, dh).transpose(0, 2, 1, 3)

    q, k, v = heads(q), heads(k), heads(v)
    w = q @ jnp.swapaxes(k, -1, -2)
    if causal:
        mask = jnp.triu(jnp.ones((S, S), dtype=bool), k=1)
        w = jnp.where(mask, -jnp.inf, w)
    w = w / math.sqrt(dh)
    w = jax.nn.softmax(w, axis=-1)
    o = w @ v                                          # (B, H, S, dh)
    o = o.transpose(0, 2, 1, 3).reshape(B, S, D)
    return o @ w_out + b_out


if __name__ == "__main__":
    # Small shapes consistent with the module: B=2, S=8, D=32, 4 heads.
    B, S, D, H = 2, 8, 32, 4

    key = jax.random.PRNGKey(0)
    kx, kwi, kbi, kwo, kbo = jax.random.split(key, 5)

    x = jax.random.normal(kx, (B, S, D), dtype=jnp.float32)

    # PyTorch shapes: in_proj.weight (3D, D), out_proj.weight (D, D); stored
    # transposed here for the x @ W convention.
    scale_in = 1.0 / math.sqrt(D)
    w_in = jax.random.uniform(kwi, (D, 3 * D), jnp.float32, -scale_in, scale_in)
    b_in = jax.random.uniform(kbi, (3 * D,), jnp.float32, -scale_in, scale_in)
    w_out = jax.random.uniform(kwo, (D, D), jnp.float32, -scale_in, scale_in)
    b_out = jax.random.uniform(kbo, (D,), jnp.float32, -scale_in, scale_in)

    # Default path (casual_mask=False, as in the module's forward default).
    out = self_attention(x, w_in, b_in, w_out, b_out, n_heads=H)
    out = jax.block_until_ready(out)
    ref = _reference(x, w_in, b_in, w_out, b_out, H)
    assert out.shape == (B, S, D)
    assert jnp.allclose(out, ref, atol=1e-4, rtol=1e-4), "mismatch vs reference"

    # Causal path.
    out_c = self_attention(x, w_in, b_in, w_out, b_out, n_heads=H, causal=True)
    out_c = jax.block_until_ready(out_c)
    ref_c = _reference(x, w_in, b_in, w_out, b_out, H, causal=True)
    assert jnp.allclose(out_c, ref_c, atol=1e-4, rtol=1e-4), "causal mismatch"

    print("KERNEL_OK")
</pallas_src>

<mosaic_0001>
module attributes {stable_mosaic.version = 11 : i64} {
  func.func @_qkv_proj_kernel(%arg0: i32, %arg1: i32, %arg2: i32, %arg3: memref<1x8x32xf32, #tpu.memory_space<vmem>>, %arg4: memref<3x1x32x8xf32, #tpu.memory_space<vmem>>, %arg5: memref<3x1x1x8xf32, #tpu.memory_space<vmem>>, %arg6: memref<3x1x1x8x8xf32, #tpu.memory_space<vmem>>) attributes {dimension_semantics = [#tpu.dimension_semantics<parallel>, #tpu.dimension_semantics<parallel>, #tpu.dimension_semantics<parallel>], iteration_bounds = array<i64: 2, 1, 4>, scalar_prefetch = 0 : i64, scratch_operands = 0 : i64, tpu.core_type = #tpu.core_type<tc>, window_params = [{transform_indices = @transform_0, window_bounds = array<i64: 1, 8, 32>}, {transform_indices = @transform_1, window_bounds = array<i64: 3, 1, 32, 8>}, {transform_indices = @transform_2, window_bounds = array<i64: 3, 1, 1, 8>}, {transform_indices = @transform_3, window_bounds = array<i64: 3, 1, 1, 8, 8>}]} {
    %c0 = arith.constant 0 : index
    %c0_0 = arith.constant 0 : index
    %c0_1 = arith.constant 0 : index
    %0 = vector.load %arg3[%c0, %c0_0, %c0_1] : memref<1x8x32xf32, #tpu.memory_space<vmem>>, vector<1x8x32xf32>
    %1 = vector.shape_cast %0 : vector<1x8x32xf32> to vector<8x32xf32>
    %c0_2 = arith.constant 0 : index
    %c0_3 = arith.constant 0 : index
    %c0_4 = arith.constant 0 : index
    %c0_5 = arith.constant 0 : index
    %2 = vector.load %arg4[%c0_2, %c0_3, %c0_4, %c0_5] : memref<3x1x32x8xf32, #tpu.memory_space<vmem>>, vector<1x1x32x8xf32>
    %3 = vector.shape_cast %2 : vector<1x1x32x8xf32> to vector<32x8xf32>
    %cst = arith.constant dense<0.000000e+00> : vector<8x8xf32>
    %4 = tpu.matmul %1, %3, %cst {dimension_numbers = #tpu.dot_dimension_numbers<[1], [0], [0], [1], [0, 0, 1, 1], [], []>} : vector<8x32xf32>, vector<32x8xf32>, vector<8x8xf32> -> vector<8x8xf32>
    %c0_6 = arith.constant 0 : index
    %c0_7 = arith.constant 0 : index
    %c0_8 = arith.constant 0 : index
    %c0_9 = arith.constant 0 : index
    %5 = vector.load %arg5[%c0_6, %c0_7, %c0_8, %c0_9] : memref<3x1x1x8xf32, #tpu.memory_space<vmem>>, vector<1x1x1x8xf32>
    %6 = vector.shape_cast %5 : vector<1x1x1x8xf32> to vector<1x8xf32>
    %7 = vector.broadcast %6 : vector<1x8xf32> to vector<8x8xf32>
    %8 = arith.addf %4, %7 : vector<8x8xf32>
    %c0_10 = arith.constant 0 : index
    %c0_11 = arith.constant 0 : index
    %c0_12 = arith.constant 0 : index
    %c0_13 = arith.constant 0 : index
    %c0_14 = arith.constant 0 : index
    %9 = vector.load %arg6[%c0_10, %c0_11, %c0_12, %c0_13, %c0_14] : memref<3x1x1x8x8xf32, #tpu.memory_space<vmem>>, vector<1x1x1x8x8xf32>
    %10 = vector.shape_cast %9 : vector<1x1x1x8x8xf32> to vector<8x8xf32>
    %11 = vector.shape_cast %8 : vector<8x8xf32> to vector<1x1x1x8x8xf32>
    tpu.vector_store %arg6[%c0_10, %c0_11, %c0_12, %c0_13, %c0_14], %11 {strides = array<i32>} : memref<3x1x1x8x8xf32, #tpu.memory_space<vmem>>, vector<1x1x1x8x8xf32>,
    %c1 = arith.constant 1 : index
    %c0_15 = arith.constant 0 : index
    %c0_16 = arith.constant 0 : index
    %c0_17 = arith.constant 0 : index
    %12 = vector.load %arg4[%c1, %c0_15, %c0_16, %c0_17] : memref<3x1x32x8xf32, #tpu.memory_space<vmem>>, vector<1x1x32x8xf32>
    %13 = vector.shape_cast %12 : vector<1x1x32x8xf32> to vector<32x8xf32>
    %cst_18 = arith.constant dense<0.000000e+00> : vector<8x8xf32>
    %14 = tpu.matmul %1, %13, %cst_18 {dimension_numbers = #tpu.dot_dimension_numbers<[1], [0], [0], [1], [0, 0, 1, 1], [], []>} : vector<8x32xf32>, vector<32x8xf32>, vector<8x8xf32> -> vector<8x8xf32>
    %c1_19 = arith.constant 1 : index
    %c0_20 = arith.constant 0 : index
    %c0_21 = arith.constant 0 : index
    %c0_22 = arith.constant 0 : index
    %15 = vector.load %arg5[%c1_19, %c0_20, %c0_21, %c0_22] : memref<3x1x1x8xf32, #tpu.memory_space<vmem>>, vector<1x1x1x8xf32>
    %16 = vector.shape_cast %15 : vector<1x1x1x8xf32> to vector<1x8xf32>
    %17 = vector.broadcast %16 : vector<1x8xf32> to vector<8x8xf32>
    %18 = arith.addf %14, %17 : vector<8x8xf32>
    %c1_23 = arith.constant 1 : index
    %c0_24 = arith.constant 0 : index
    %c0_25 = arith.constant 0 : index
    %c0_26 = arith.constant 0 : index
    %c0_27 = arith.constant 0 : index
    %19 = vector.load %arg6[%c1_23, %c0_24, %c0_25, %c0_26, %c0_27] : memref<3x1x1x8x8xf32, #tpu.memory_space<vmem>>, vector<1x1x1x8x8xf32>
    %20 = vector.shape_cast %19 : vector<1x1x1x8x8xf32> to vector<8x8xf32>
    %21 = vector.shape_cast %18 : vector<8x8xf32> to vector<1x1x1x8x8xf32>
    tpu.vector_store %arg6[%c1_23, %c0_24, %c0_25, %c0_26, %c0_27], %21 {strides = array<i32>} : memref<3x1x1x8x8xf32, #tpu.memory_space<vmem>>, vector<1x1x1x8x8xf32>,
    %c2 = arith.constant 2 : index
    %c0_28 = arith.constant 0 : index
    %c0_29 = arith.constant 0 : index
    %c0_30 = arith.constant 0 : index
    %22 = vector.load %arg4[%c2, %c0_28, %c0_29, %c0_30] : memref<3x1x32x8xf32, #tpu.memory_space<vmem>>, vector<1x1x32x8xf32>
    %23 = vector.shape_cast %22 : vector<1x1x32x8xf32> to vector<32x8xf32>
    %cst_31 = arith.constant dense<0.000000e+00> : vector<8x8xf32>
    %24 = tpu.matmul %1, %23, %cst_31 {dimension_numbers = #tpu.dot_dimension_numbers<[1], [0], [0], [1], [0, 0, 1, 1], [], []>} : vector<8x32xf32>, vector<32x8xf32>, vector<8x8xf32> -> vector<8x8xf32>
    %c2_32 = arith.constant 2 : index
    %c0_33 = arith.constant 0 : index
    %c0_34 = arith.constant 0 : index
    %c0_35 = arith.constant 0 : index
    %25 = vector.load %arg5[%c2_32, %c0_33, %c0_34, %c0_35] : memref<3x1x1x8xf32, #tpu.memory_space<vmem>>, vector<1x1x1x8xf32>
    %26 = vector.shape_cast %25 : vector<1x1x1x8xf32> to vector<1x8xf32>
    %27 = vector.broadcast %26 : vector<1x8xf32> to vector<8x8xf32>
    %28 = arith.addf %24, %27 : vector<8x8xf32>
    %c2_36 = arith.constant 2 : index
    %c0_37 = arith.constant 0 : index
    %c0_38 = arith.constant 0 : index
    %c0_39 = arith.constant 0 : index
    %c0_40 = arith.constant 0 : index
    %29 = vector.load %arg6[%c2_36, %c0_37, %c0_38, %c0_39, %c0_40] : memref<3x1x1x8x8xf32, #tpu.memory_space<vmem>>, vector<1x1x1x8x8xf32>
    %30 = vector.shape_cast %29 : vector<1x1x1x8x8xf32> to vector<8x8xf32>
    %31 = vector.shape_cast %28 : vector<8x8xf32> to vector<1x1x1x8x8xf32>
    tpu.vector_store %arg6[%c2_36, %c0_37, %c0_38, %c0_39, %c0_40], %31 {strides = array<i32>} : memref<3x1x1x8x8xf32, #tpu.memory_space<vmem>>, vector<1x1x1x8x8xf32>,
    return
  }
  func.func @transform_0(%arg0: i32, %arg1: i32, %arg2: i32) -> (i32, i32, i32) {
    %c0_i32 = arith.constant 0 : i32
    %c0_i32_0 = arith.constant 0 : i32
    return %arg0, %arg1, %c0_i32 : i32, i32, i32
  }
  func.func @transform_1(%arg0: i32, %arg1: i32, %arg2: i32) -> (i32, i32, i32, i32) {
    %c0_i32 = arith.constant 0 : i32
    %c0_i32_0 = arith.constant 0 : i32
    %c0_i32_1 = arith.constant 0 : i32
    %c0_i32_2 = arith.constant 0 : i32
    return %c0_i32, %arg2, %c0_i32_0, %c0_i32_1 : i32, i32, i32, i32
  }
  func.func @transform_2(%arg0: i32, %arg1: i32, %arg2: i32) -> (i32, i32, i32, i32) {
    %c0_i32 = arith.constant 0 : i32
    %c0_i32_0 = arith.constant 0 : i32
    %c0_i32_1 = arith.constant 0 : i32
    %c0_i32_2 = arith.constant 0 : i32
    return %c0_i32, %arg2, %c0_i32_0, %c0_i32_1 : i32, i32, i32, i32
  }
  func.func @transform_3(%arg0: i32, %arg1: i32, %arg2: i32) -> (i32, i32, i32, i32, i32) {
    %c0_i32 = arith.constant 0 : i32
    %c0_i32_0 = arith.constant 0 : i32
    %c0_i32_1 = arith.constant 0 : i32
    return %c0_i32, %arg2, %arg0, %arg1, %c0_i32_0 : i32, i32, i32, i32, i32
  }
}

</mosaic_0001>

<bundles_post_ra>
// kernel: tpu_custom_call.1
= control target key start
LH: loop header
LB: loop body
LE: loop exit
PB: predicated region body
PF: predicated region fallthrough
CT: control target
= control target key end

     0   :  { %8 = vsyncpa [#allocation5], 0  ;;  %s1272_s0 = inlined_call_operand.vmem [shape: f32[2,8,32], index: 0, kind: input, shape index: {}]   ;;  %s1273_s1 = inlined_call_operand.vmem [shape: f32[3,4,32,8], index: 1, kind: input, shape index: {}]   ;;  %s1274_s2 = inlined_call_operand.vmem [shape: f32[3,4,1,8], index: 2, kind: input, shape index: {}]   ;;  %s1275_s3 = inlined_call_operand.hbm [shape: f32[3,4,2,8,8], index: 3, kind: output, shape index: {}]  }
   0x1   :  { %10 = vsyncpa [#allocation5 + $0x1], 0  ;;  %s1065_s12 = smov 0   ;;  %s1067_s13 = smov 0  }
   0x2   :  { %s1069_s14 = smov 0   ;;  %s1071_s15 = smov 0  }
   0x3   :  { %s1073_s16 = smov 0   ;;  %s1075_s17 = smov 0  }
   0x4   :  { %s1077_s18 = smov 0   ;;  %s1079_s19 = smov 0  }
   0x5   :  { %s1081_s20 = smov 0   ;;  %s1083_s21 = smov 0  }
   0x6 LB: > { %s753_s22 = sadd.s32 4294967295, %s1037_s21   ;;  %s754_s23 = sadd.s32 4294967294, %s1037_s21   ;;  %s1037_s21 = sphi %s1083_s21, %s16_s21   ;;  %s1033_s20 = sphi %s1081_s20, %s1287_s20   ;;  %s1029_s19 = sphi %s1079_s19, %s1286_s19   ;;  %s1025_s18 = sphi %s1077_s18, %s1285_s18   ;;  %s1021_s17 = sphi %s1075_s17, %s1284_s17   ;;  %s1017_s16 = sphi %s1073_s16, %s1283_s16   ;;  %s1013_s15 = sphi %s1071_s15, %s1282_s15   ;;  %s1009_s14 = sphi %s1069_s14, %s1281_s14   ;;  %s1005_s13 = sphi %s1067_s13, %s1280_s13   ;;  %s1001_s12 = sphi %s1065_s12, %s1279_s12  }
   0x7   : > { %s28_s24 = sadd.s32 1, %s1029_s19  ;;  %s35_s25 = sadd.s32 1, %s1033_s20 }
   0x8   : > { %p29_p0 = scmp.ge.s32.totalorder %s28_s24, 4  ;;  %s70_s26 = sadd.s32 1, %s1017_s16 }
   0x9   : > { %p77_p1 = scmp.ne.s32.totalorder %s1017_s16, %s1013_s15  ;;  %p78_p2 = scmp.eq.s32.totalorder %s1037_s21, 0 }
   0xa   : > { %s1289_s24 = smov (%p29_p0, %s28_s24), 0  ;;  %s1291_s25 = smov (!%p29_p0, %s35_s25), %s1033_s20 }
   0xb   : > { %s67_s27 = ssub.s32 %s1029_s19, %s1289_s24  ;;  %p1128_p3 = por %p78_p2, %p77_p1 }
   0xc   : > { %p37_p4 = scmp.ge.s32.totalorder %s1291_s25, 2  ;;  %p68_p5 = scmp.eq.s32.totalorder %s67_s27, 0 }
   0xd   : > { %s126_s29 = sadd.s32 1, %s1009_s14  ;;  %p136_p6 = scmp.ne.s32.totalorder %s1009_s14, %s1005_s13 }
   0xe   : > { %s1293_s25 = smov (%p37_p4, %s1291_s25), 0  ;;  %p137_p7 = scmp.eq.s32.totalorder %s753_s22, 7 }
   0xf   : > { %s1138_s30 = scalar_select %p68_p5, %s1017_s16, %s70_s26  }
  0x10   : > { %s120_s4 = ssub.s32 %s1033_s20, %s1293_s25  ;;  %p142_p8 = scmp.ne.s32.totalorder %s1005_s13, %s1001_s12 }
  0x11   : > { %s121_s5 = sor.u32 %s120_s4, %s67_s27  ;;  %p1144_p10 = por %p137_p7, %p136_p6 }
  0x12   : > { %p124_p9 = scmp.eq.s32.totalorder %s121_s5, 0  ;;  %p143_p11 = scmp.eq.s32.totalorder %s754_s23, 7 }
  0x13   : > { %p756_p13 = scmp.ge.s32.totalorder %s1037_s21, 8 }
  0x14   : > { %s1149_s7 = scalar_select %p124_p9, %s1009_s14, %s126_s29  }
  0x15   : > { %p1151_p12 = por %p143_p11, %p142_p8  ;;  %159 = sbr.rel (%p756_p13) target bundleno = 43 (0x2b), region = 16 }
  0x1a   : > { %172 = sbr.rel (!%p1128_p3) target bundleno = 37 (0x25), region = 24  ;;  %s174_s9 = sand.u32 (%p1128_p3), 1, %s1017_s16  }
  0x1b   : > { %s783_s10 = sshll.u32 (%p1128_p3), %s1029_s19, 5  ;;  %s832_s11 = smul.u32 (%p1128_p3), 96, %s174_s9 }
  0x1c   : > { %s179_s23 = scalar_lea.vmem (%p1128_p3), %s1273_s1, %s783_s10 }
  0x1d   : > { %v230_v0 = vld [vmem:[%s179_s23] sm:$0xff] (%p1128_p3)  ;;  %v232_v1 = vld [vmem:[%s179_s23 + $0x8] sm:$0xff] (%p1128_p3)  ;;  %v234_v2 = vld [vmem:[%s179_s23 + $0x10] sm:$0xff] (%p1128_p3)  ;;  %s176_s27 = scalar_lea.vmem (%p1128_p3), [#allocation2], %s832_s11 }
  0x1e   : > { %v236_v3 = vld [vmem:[%s179_s23 + $0x18] sm:$0xff] (%p1128_p3)  ;;  %v238_v4 = vld [vmem:[%s179_s23 + $0x80] sm:$0xff] (%p1128_p3)  ;;  %v240_v5 = vld [vmem:[%s179_s23 + $0x88] sm:$0xff] (%p1128_p3)  ;;  %231 = vst [vmem:[%s176_s27] sm:$0xff] (%p1128_p3), %v230_v0 }
  0x1f   : > { %233 = vst [vmem:[%s176_s27 + $0x8] sm:$0xff] %v232_v1  ;;  %235 = vst [vmem:[%s176_s27 + $0x10] sm:$0xff] %v234_v2  ;;  %v242_v6 = vld [vmem:[%s179_s23 + $0x90] sm:$0xff]  ;;  %v244_v7 = vld [vmem:[%s179_s23 + $0x98] sm:$0xff] }
  0x20   : > { %237 = vst [vmem:[%s176_s27 + $0x18] sm:$0xff] %v236_v3  ;;  %239 = vst [vmem:[%s176_s27 + $0x20] sm:$0xff] %v238_v4  ;;  %v246_v8 = vld [vmem:[%s179_s23 + $0x100] sm:$0xff]  ;;  %v248_v9 = vld [vmem:[%s179_s23 + $0x108] sm:$0xff] }
  0x21   : > { %241 = vst [vmem:[%s176_s27 + $0x28] sm:$0xff] %v240_v5  ;;  %243 = vst [vmem:[%s176_s27 + $0x30] sm:$0xff] %v242_v6  ;;  %v250_v10 = vld [vmem:[%s179_s23 + $0x110] sm:$0xff]  ;;  %v252_v11 = vld [vmem:[%s179_s23 + $0x118] sm:$0xff] }
  0x22   : > { %245 = vst [vmem:[%s176_s27 + $0x38] sm:$0xff] %v244_v7  ;;  %247 = vst [vmem:[%s176_s27 + $0x40] sm:$0xff] %v246_v8 }
  0x23   : > { %249 = vst [vmem:[%s176_s27 + $0x48] sm:$0xff] %v248_v9  ;;  %251 = vst [vmem:[%s176_s27 + $0x50] sm:$0xff] %v250_v10 }
  0x24   : > { %253 = vst [vmem:[%s176_s27 + $0x58] sm:$0xff] %v252_v11 }
  0x25 PF: > { %259 = sbr.rel (!%p1128_p3) target bundleno = 43 (0x2b), region = 62  ;;  %s261_s29 = sand.u32 (%p1128_p3), 1, %s1017_s16  }
  0x26   : > { %s264_s9 = scalar_lea.vmem (%p1128_p3), %s1274_s2, %s1029_s19  ;;  %s833_s10 = smul.u32 (%p1128_p3), 3, %s261_s29 }
  0x27   : > { %v281_v12 = vld [vmem:[%s264_s9] sm:$0x1] (%p1128_p3)  ;;  %v283_v13 = vld [vmem:[%s264_s9 + $0x4] sm:$0x1] (%p1128_p3)  ;;  %v285_v14 = vld [vmem:[%s264_s9 + $0x8] sm:$0x1] (%p1128_p3) }
  0x28   : > { %s263_s11 = scalar_lea.vmem (%p1128_p3), [#allocation3], %s833_s10 }
  0x29   : > { %282 = vst [vmem:[%s263_s11] sm:$0x1] (%p1128_p3), %v281_v12  ;;  %284 = vst [vmem:[%s263_s11 + $0x1] sm:$0x1] (%p1128_p3), %v283_v13 }
  0x2a   : > { %286 = vst [vmem:[%s263_s11 + $0x2] sm:$0x1] %v285_v14 }
  0x2b PF: > { %p759_p0 = scmp.ge.s32.totalorder %s1037_s21, 1  ;;  %p307_p1 = scmp.lt.s32.totalorder %s1037_s21, 9 }
  0x2d   : > { %p308_p2 = pnand %p759_p0, %p307_p1 }
  0x2e   : > { %s314_s28 = sand.u32 (!%p308_p2), 1, %s1013_s15   ;;  %p355_p3 = scmp.lt.s32.totalorder (!%p308_p2), %s1025_s18, 1 }
  0x2f   : > { %311 = sbr.rel (%p308_p2) target bundleno = 280 (0x118), region = 96  ;;  %s352_s10 = sand.u32 (!%p308_p2), 1, %s1005_s13  }
  0x30   : > { %s834_s22 = smul.u32 (!%p308_p2), 96, %s314_s28  ;;  %s1215_s4 = scalar_lea.sflag (!%p308_p2), [#allocation5], %s352_s10 }
  0x31   : > { %s835_s9 = smul.u32 (!%p308_p2), 3, %s314_s28 }
  0x32   : > { %s1179_s23 = scalar_lea.vmem (!%p308_p2), [#allocation2], %s834_s22  ;;  %s836_s11 = smul.u32 (!%p308_p2), 24, %s352_s10 }
  0x33   : > { %s323_s22 = scalar_lea.vmem (!%p308_p2), [#allocation3], %s835_s9  ;;  %s1041_s9 = smov (!%p308_p2), [#allocation4]  }
  0x34   : > { %v1039_v15 = vmov 0.0   ;;  %vm1040_vm0 = vmmov 0   ;;  %s356_s26 = scalar_select %p355_p3, %s1025_s18, 1  ;;  %v366_v16 = vld [vmem:[%s1179_s23 + $0x18] sm:$0xff]  ;;  %v365_v17 = vld [vmem:[%s1179_s23 + $0x10] sm:$0xff]  ;;  %v364_v20 = vld [vmem:[%s1179_s23 + $0x8] sm:$0xff] }
  0x35   : > { %799 = vmatprep.subr.mxu0 %v1039_v15  ;;  %810 = vmatprep.subr.mxu1 %v1039_v15  ;;  %v766_v18 = vld [vmem:[%s1179_s23 + $0x38] sm:$0xff]  ;;  %v765_v19 = vld [vmem:[%s1179_s23 + $0x30] sm:$0xff]  ;;  %v764_v21 = vld [vmem:[%s1179_s23 + $0x28] sm:$0xff]  ;;  %vm374_vm1 = vcmask 261120   ;;  %vm448_vm2 = vcmask 64512  }
  0x36   : > { %807 = vmatprep.mubr.msk.f32.mxu0 %vm1040_vm0, %v1039_v15  ;;  %818 = vmatprep.mubr.msk.f32.mxu1 %vm1040_vm0, %v1039_v15  ;;  %s760_s27 = sshll.u32 %s356_s26, 3  ;;  %v363_v22 = vld [vmem:[%s1179_s23] sm:$0xff]  ;;  %v774_v24 = vld [vmem:[%s1179_s23 + $0x58] sm:$0xff]  ;;  %v773_v26 = vld [vmem:[%s1179_s23 + $0x50] sm:$0xff]  ;;  %s779_s26 = sshll.u32 %s1021_s17, 1 }
  0x37   : > { %800 = vmatpush3.msra.mxu0 %v366_v16  ;;  %811 = vmatpush3.msra.mxu1 %v766_v18  ;;  %s361_s5 = scalar_lea.vmem %s1272_s0, %s760_s27  ;;  %v763_v25 = vld [vmem:[%s1179_s23 + $0x20] sm:$0xff]  ;;  %v772_v27 = vld [vmem:[%s1179_s23 + $0x48] sm:$0xff]  ;;  %s354_s27 = scalar_lea.vmem [#allocation4], %s836_s11 }
  0x38   : > { %801 = vmatprep.subr.mxu0 %v1039_v15  ;;  %812 = vmatprep.subr.mxu1 %v1039_v15  ;;  %v362_v23 = vld [vmem:[%s361_s5] sm:$0xff]  ;;  %s636_s29 = sshll.u32 %s354_s27, 4  ;;  %s933_s11 = sshll.u32 %s1041_s9, 4  ;;  %s1207_s29 = int_to_ptr.vmem [resolvable:$true] %s636_s29  ;;  %s934_s11 = int_to_ptr.vmem [resolvable:$false] %s933_s11 }
  0x39   : > { %802 = vmatpush3.msra.mxu0 %v365_v17  ;;  %813 = vmatpush3.msra.mxu1 %v765_v19  ;;  %v771_v28 = vld [vmem:[%s1179_s23 + $0x40] sm:$0xff]  ;;  %s633_s23 = sadd.s32 %s1025_s18, %s779_s26  ;;  %s929_s5 = scalar_lea.vmem %s1207_s29, 384 }
  0x3a   : > { %803 = vmatprep.subr.mxu0 %v1039_v15  ;;  %814 = vmatprep.subr.mxu1 %v1039_v15  ;;  %v761_v29 = vld [vmem:[%s323_s22] ss:$0 sm:$0xff]  ;;  %v768_v31 = vld [vmem:[%s323_s22 + $0x1] ss:$0 sm:$0xff]  ;;  %s780_s15 = sshll.u32 %s633_s23, 7  ;;  %p930_p4 = scmp.ne.s32.totalorder %s1207_s29, %s929_s5 }
  0x3b   : > { %804 = vmatpush3.msra.mxu0 %v364_v20  ;;  %815 = vmatpush3.msra.mxu1 %v764_v21  ;;  %v776_v37 = vld [vmem:[%s323_s22 + $0x2] ss:$0 sm:$0xff]  ;;  %s1212_s18 = scalar_lea.hbm %s1275_s3, %s780_s15  ;;  %s935_s22 = scalar_lea.vmem %s934_s11, 768 }
  0x3c   : > { %805 = vmatprep.subr.mxu0 %v1039_v15  ;;  %816 = vmatprep.subr.mxu1 %v1039_v15  ;;  %p931_p5 = pnand %p930_p4, %p1144_p10  ;;  %p936_p7 = scmp.lt.s32.totalorder %s1207_s29, %s934_s11 }
  0x3d   : > { %806 = vmatpush3.msra.mxu0 %v363_v22  ;;  %817 = vmatpush3.msra.mxu1 %v763_v25  ;;  %p937_p8 = scmp.lt.s32.totalorder %s935_s22, %s929_s5 }
  0x3e   : > { %808 = vmatmul.mubr.msk.f32.vlgmr.msra.gmra.mxu0 %vm374_vm1, %v362_v23  ;;  %821 = vmatprep.subr.mxu0 %v1039_v15  ;;  %p932_p6 = pneg %p931_p5 }
  0x3f   : > { %822 = vmatpush3.msra.mxu0 %v774_v24  ;;  %819 = vmatmul.mubr.msk.f32.vlgmr.msra.gmra.mxu1 %vm374_vm1, %v362_v23  ;;  %p938_p9 = por %p937_p8, %p936_p7 }
  0x40   : > { %823 = vmatprep.subr.mxu0 %v1039_v15  ;;  %829 = vmatprep.mubr.msk.f32.mxu0 %vm1040_vm0, %v1039_v15 }
  0x41   : > { %824 = vmatpush3.msra.mxu0 %v773_v26  ;;  %p939_p11 = pnand %p938_p9, %p932_p6 }
  0x42   : > { %825 = vmatprep.subr.mxu0 %v1039_v15 }
  0x43   : > { %826 = vmatpush3.msra.mxu0 %v772_v27 }
  0x44   : > { %827 = vmatprep.subr.mxu0 %v1039_v15 }
  0x45   : > { %828 = vmatpush3.msra.mxu0 %v771_v28 }
  0x46   : > { %830 = vmatmul.mubr.msk.f32.vlgmr.msra.gmra.mxu0 %vm374_vm1, %v362_v23 }
  0xfe   : > { %v444_v30 = vpop.f32.mrf.mxu0 }
  0xff   : > { %v445_v32 = vadd.f32 %v761_v29, %v444_v30  ;;  %v529_v34 = vpop.f32.mrf.mxu1 }
 0x100   : > { %v809_v33 = vpop.f32.mrf.mxu0  ;;  %v530_v35 = vadd.f32 %v768_v31, %v529_v34 }
 0x101   : > { %449 = vst.msk [vmem:[%s354_s27] sm:$0xff] %vm448_vm2, %v445_v32  ;;  %v820_v36 = vpop.f32.mrf.mxu1 }
 0x102   : > { %770 = vst.msk [vmem:[%s354_s27 + $0x8] sm:$0xff] %vm448_vm2, %v530_v35 }
 0x106   : > { %v614_v38 = vpop.f32.mrf.mxu0 }
 0x107   : > { %v615_v39 = vadd.f32 %v776_v37, %v614_v38 }
 0x108   : > { %v831_v40 = vpop.f32.mrf.mxu0 }
 0x109   : > { %778 = vst.msk [vmem:[%s354_s27 + $0x10] sm:$0xff] %vm448_vm2, %v615_v39 }
 0x10a   : > { %942 = shalt.err (!%p939_p11)
}
 0x10b   : > { %s943_s10 = scalar_lea.hbm %s1212_s18, 384  ;;  %s947_s27 = scalar_lea.hbm %s1275_s3, 3072 }
 0x10c   : > { %p944_p13 = scmp.ne.s32.totalorder %s1212_s18, %s943_s10  ;;  %p948_p2 = scmp.lt.s32.totalorder %s1212_s18, %s1275_s3 }
 0x10d   : > { %p949_p3 = scmp.lt.s32.totalorder %s947_s27, %s943_s10 }
 0x10e   : > { %p945_p0 = pnand %p944_p13, %p1144_p10 }
 0x10f   : > { %p950_p4 = por %p949_p3, %p948_p2 }
 0x110   : > { %p946_p1 = pneg %p945_p0 }
 0x112   : > { %p951_p5 = pnand %p950_p4, %p946_p1 }
 0x114   : > { %954 = shalt.err (!%p951_p5)
}
 0x115   : > { %s1042_s28 = smov 128   ;;  %s1043_s5 = smov 1024  }
 0x116   : > { %s1044_s9 = smov 8  }
 0x117   : > { %837 = dma.vmem_to_hbm [thread:$0]  (%p1144_p10), %s1207_s29, 384, %s1212_s18, %s1215_s4, %s1042_s28, %s1043_s5, %s1044_s9  }
 0x118 PF: > { %p843_p6 = scmp.ge.s32.totalorder %s1037_s21, 2  ;;  %s651_s11 = sand.u32 1, %s1001_s12  }
 0x119   : > { %s652_s22 = scalar_lea.sflag [#allocation5], %s651_s11 }
 0x11a   : > { %p840_p7 = pnand %p843_p6, %p1151_p12 }
 0x11c   : > { %p841_p8 = pneg %p840_p7 }
 0x11e   : > { %996 = dma.done.wait (%p841_p8), %s652_s22, 384  }
 0x11f   : > { %998 = vsyncadd (%p841_p8), %s652_s22, 4294966912  ;;  %s16_s21 = sadd.s32 1, %s1037_s21   ;;  %s1279_s12 = smov %s1005_s13 }
 0x120   : > { %p13_p9 = scmp.ge.s32.totalorder %s16_s21, 10   ;;  %s1280_s13 = smov %s1009_s14 }
 0x121   : > { %s1281_s14 = smov %s1149_s7  ;;  %s1282_s15 = smov %s1017_s16 }
 0x122   : > { %s1283_s16 = smov %s1138_s30  ;;  %s1284_s17 = smov %s1029_s19 }
 0x123   : > { %s1285_s18 = smov %s1033_s20  ;;  %s1286_s19 = smov %s1289_s24 }
 0x124   : > { %s1287_s20 = smov %s1293_s25  ;;  %15 = sbr.rel (!%p13_p9) target bundleno = 6 (0x6), region = 161 }
 0x129   :  { %657 = vsyncpa [#allocation5], 1 }
 0x12a   :  { %659 = vsyncpa [#allocation5 + $0x1], 1 }

</bundles_post_ra>
